<compile_context>
chip_gen: v7x
topology: tpu7x:2x2x1
jax: 0.10.0
libtpu: 0.0.40
codegen_flags: <defaults>
</compile_context>

<pallas_src>
import jax
import jax.numpy as jnp
from jax.experimental import pallas as pl
from jax.experimental.pallas import tpu as pltpu


def color_valuation_kernel(zc_ref, a_ref, out_ref):
    # zc_ref: (3, TB)  color channels [blue, green, red], batch on lanes.
    # a_ref : (3, TB)  one-hot selector, batch on lanes.
    # out   : (1, TB)  lane-dense probabilities.
    acc = (a_ref[0:1, :] * zc_ref[0:1, :]
           + a_ref[1:2, :] * zc_ref[1:2, :]
           + a_ref[2:3, :] * zc_ref[2:3, :])
    out_ref[...] = acc.astype(out_ref.dtype)


def color_valuation(z, a, *, tb=1024):
    """z: (B, 9), a: (B, 3) one-hot. Returns (B,) probabilities.

    NOTE: for tiny batches (or when this op sits next to other elementwise
    work) a fused XLA expression `(a * z[:, 3:6]).sum(-1)` is cheaper than a
    standalone pallas_call; this kernel targets large-B streaming.
    """
    B, D = z.shape
    assert D == 9, f"expected 9 object features, got {D}"
    assert a.shape == (B, 3), f"expected one-hot selector (B, 3), got {a.shape}"

    out_dtype = jnp.promote_types(z.dtype, a.dtype)

    # Layout plumbing (fused XLA pass): keep only the 3 color columns of z and
    # put the batch dimension on the lane (last) axis.  No extra dtype casts.
    zc = jnp.transpose(z[:, 3:6])          # (3, B)
    at = jnp.transpose(a)                  # (3, B)

    # Lane tile: multiple of 128, capped by the (rounded-up) batch size.
    lane = 128
    b_lane = ((B + lane - 1) // lane) * lane
    TB = min(int(tb), b_lane)
    TB = ((TB + lane - 1) // lane) * lane
    Bp = ((B + TB - 1) // TB) * TB
    if Bp != B:
        pad = Bp - B
        zc = jnp.pad(zc, ((0, 0), (0, pad)))   # zero pad -> padded probs are 0
        at = jnp.pad(at, ((0, 0), (0, pad)))

    out = pl.pallas_call(
        color_valuation_kernel,
        out_shape=jax.ShapeDtypeStruct((1, Bp), out_dtype),
        grid_spec=pltpu.PrefetchScalarGridSpec(
            num_scalar_prefetch=0,
            grid=(Bp // TB,),
            in_specs=[
                pl.BlockSpec((3, TB), lambda i: (0, i)),   # z color rows
                pl.BlockSpec((3, TB), lambda i: (0, i)),   # one-hot selector
            ],
            out_specs=pl.BlockSpec((1, TB), lambda i: (0, i)),
        ),
        compiler_params=pltpu.CompilerParams(
            dimension_semantics=("parallel",),
        ),
    )(zc, at)
    return out[0, :B]


def color_valuation_ref(z, a):
    # Pure-JAX reference matching the PyTorch forward.
    return jnp.sum(a * z[:, 3:6], axis=1)


if __name__ == "__main__":
    key = jax.random.PRNGKey(0)
    kz, ka, kz2, ka2 = jax.random.split(key, 4)

    # Small deterministic test matching the module's expected shapes.
    B = 8
    z = jax.random.uniform(kz, (B, 9), dtype=jnp.float32)
    color_idx = jax.random.randint(ka, (B,), 0, 3)
    a = jax.nn.one_hot(color_idx, 3, dtype=jnp.float32)

    out = color_valuation(z, a)
    jax.block_until_ready(out)
    ref = color_valuation_ref(z, a)
    assert out.shape == (B,)
    assert jnp.allclose(out, ref, atol=1e-6), (out, ref)

    # Second check: non-multiple-of-128 batch with a multi-block grid
    # (exercises zero padding + pipelined batch tiling).
    B2 = 300
    z2 = jax.random.uniform(kz2, (B2, 9), dtype=jnp.float32)
    a2 = jax.nn.one_hot(jax.random.randint(ka2, (B2,), 0, 3), 3,
                        dtype=jnp.float32)
    out2 = color_valuation(z2, a2, tb=128)
    jax.block_until_ready(out2)
    ref2 = color_valuation_ref(z2, a2)
    assert out2.shape == (B2,)
    assert jnp.allclose(out2, ref2, atol=1e-6), (out2, ref2)

    print("KERNEL_OK")
</pallas_src>

<mosaic_0001>
module attributes {stable_mosaic.version = 11 : i64} {
  func.func @color_valuation_kernel(%arg0: i32, %arg1: memref<3x128xf32, #tpu.memory_space<vmem>>, %arg2: memref<3x128xf32, #tpu.memory_space<vmem>>, %arg3: memref<1x128xf32, #tpu.memory_space<vmem>>) attributes {dimension_semantics = [#tpu.dimension_semantics<parallel>], iteration_bounds = array<i64: 1>, scalar_prefetch = 0 : i64, scratch_operands = 0 : i64, tpu.core_type = #tpu.core_type<tc>, window_params = [{transform_indices = @transform_0, window_bounds = array<i64: 3, 128>}, {transform_indices = @transform_1, window_bounds = array<i64: 3, 128>}, {transform_indices = @transform_2, window_bounds = array<i64: 1, 128>}]} {
    %c0 = arith.constant 0 : index
    %c0_0 = arith.constant 0 : index
    %0 = vector.load %arg2[%c0, %c0_0] : memref<3x128xf32, #tpu.memory_space<vmem>>, vector<1x128xf32>
    %c0_1 = arith.constant 0 : index
    %c0_2 = arith.constant 0 : index
    %1 = vector.load %arg1[%c0_1, %c0_2] : memref<3x128xf32, #tpu.memory_space<vmem>>, vector<1x128xf32>
    %2 = arith.mulf %0, %1 : vector<1x128xf32>
    %c1 = arith.constant 1 : index
    %c0_3 = arith.constant 0 : index
    %3 = vector.load %arg2[%c1, %c0_3] : memref<3x128xf32, #tpu.memory_space<vmem>>, vector<1x128xf32>
    %c1_4 = arith.constant 1 : index
    %c0_5 = arith.constant 0 : index
    %4 = vector.load %arg1[%c1_4, %c0_5] : memref<3x128xf32, #tpu.memory_space<vmem>>, vector<1x128xf32>
    %5 = arith.mulf %3, %4 : vector<1x128xf32>
    %6 = arith.addf %2, %5 : vector<1x128xf32>
    %c2 = arith.constant 2 : index
    %c0_6 = arith.constant 0 : index
    %7 = vector.load %arg2[%c2, %c0_6] : memref<3x128xf32, #tpu.memory_space<vmem>>, vector<1x128xf32>
    %c2_7 = arith.constant 2 : index
    %c0_8 = arith.constant 0 : index
    %8 = vector.load %arg1[%c2_7, %c0_8] : memref<3x128xf32, #tpu.memory_space<vmem>>, vector<1x128xf32>
    %9 = arith.mulf %7, %8 : vector<1x128xf32>
    %10 = arith.addf %6, %9 : vector<1x128xf32>
    %c0_9 = arith.constant 0 : index
    %c0_10 = arith.constant 0 : index
    %11 = vector.load %arg3[%c0_9, %c0_10] : memref<1x128xf32, #tpu.memory_space<vmem>>, vector<1x128xf32>
    tpu.vector_store %arg3[%c0_9, %c0_10], %10 {strides = array<i32>} : memref<1x128xf32, #tpu.memory_space<vmem>>, vector<1x128xf32>,
    return
  }
  func.func @transform_0(%arg0: i32) -> (i32, i32) {
    %c0_i32 = arith.constant 0 : i32
    %c0_i32_0 = arith.constant 0 : i32
    return %c0_i32, %arg0 : i32, i32
  }
  func.func @transform_1(%arg0: i32) -> (i32, i32) {
    %c0_i32 = arith.constant 0 : i32
    %c0_i32_0 = arith.constant 0 : i32
    return %c0_i32, %arg0 : i32, i32
  }
  func.func @transform_2(%arg0: i32) -> (i32, i32) {
    %c0_i32 = arith.constant 0 : i32
    %c0_i32_0 = arith.constant 0 : i32
    return %c0_i32, %arg0 : i32, i32
  }
}

</mosaic_0001>

<bundles_post_ra>
// kernel: tpu_custom_call.1
= control target key start
LH: loop header
LB: loop body
LE: loop exit
PB: predicated region body
PF: predicated region fallthrough
CT: control target
= control target key end

     0   :  { %7 = vsyncpa [#allocation3], 0  ;;  %s193_s0 = inlined_call_operand.hbm [shape: f32[3,128], index: 0, kind: input, shape index: {}]   ;;  %s194_s1 = inlined_call_operand.hbm [shape: f32[3,128], index: 1, kind: input, shape index: {}]   ;;  %s195_s2 = inlined_call_operand.hbm [shape: f32[1,128], index: 2, kind: output, shape index: {}]  }
   0x1   :  { %8 = vsyncpa [#allocation6], 0 }
   0x2   :  { %9 = vsyncpa [#allocation4], 0  ;;  %s139_s9 = smov [#allocation2]   ;;  %s140_s11 = smov [#allocation5]  }
   0x3   :  { %s16_s10 = sshll.u32 %s139_s9, 4  ;;  %s26_s12 = sshll.u32 %s140_s11, 4  ;;  %s17_s10 = int_to_ptr.vmem [resolvable:$true] %s16_s10  ;;  %s27_s12 = int_to_ptr.vmem [resolvable:$true] %s26_s12 }
   0x4   :  { %s67_s15 = scalar_lea.hbm %s193_s0, 64 }
   0x5   :  { %p68_p0 = scmp.ne.s32.totalorder %s193_s0, %s67_s15  ;;  %p71_p1 = scmp.lt.u32.totalorder %s67_s15, %s193_s0 }
   0x7   :  { %p73_p2 = pnand %p71_p1, %p68_p0 }
   0x9   :  { %76 = shalt.err (!%p73_p2)
}
   0xa   :  { %s77_s20 = scalar_lea.vmem %s17_s10, 64  ;;  %p82_p4 = scmp.lt.s32.totalorder %s17_s10, %s17_s10 }
   0xb   :  { %p78_p3 = scmp.ne.s32.totalorder %s17_s10, %s77_s20  ;;  %p83_p5 = scmp.lt.s32.totalorder %s77_s20, %s77_s20 }
   0xd   :  { %p84_p6 = por %p83_p5, %p82_p4 }
   0xf   :  { %p85_p7 = pnand %p84_p6, %p78_p3 }
  0x11   :  { %88 = shalt.err (!%p85_p7)
}
  0x12   :  { %19 = dma.hbm_to_vmem [thread:$0]  %s193_s0, 64, %s17_s10, [#allocation3]  }
  0x13   :  { %s89_s25 = scalar_lea.hbm %s194_s1, 64 }
  0x14   :  { %p90_p8 = scmp.ne.s32.totalorder %s194_s1, %s89_s25  ;;  %p93_p9 = scmp.lt.u32.totalorder %s89_s25, %s194_s1 }
  0x16   :  { %p95_p10 = pnand %p93_p9, %p90_p8 }
  0x18   :  { %98 = shalt.err (!%p95_p10)
}
  0x19   :  { %s99_s30 = scalar_lea.vmem %s27_s12, 64  ;;  %p104_p12 = scmp.lt.s32.totalorder %s27_s12, %s27_s12 }
  0x1a   :  { %p100_p11 = scmp.ne.s32.totalorder %s27_s12, %s99_s30  ;;  %p105_p13 = scmp.lt.s32.totalorder %s99_s30, %s99_s30 }
  0x1c   :  { %p106_p0 = por %p105_p13, %p104_p12 }
  0x1e   :  { %p107_p1 = pnand %p106_p0, %p100_p11 }
  0x20   :  { %110 = shalt.err (!%p107_p1)
}
  0x21   :  { %29 = dma.hbm_to_vmem [thread:$0]  %s194_s1, 64, %s27_s12, [#allocation6]  }
  0x22   :  { %133 = dma.done.wait [#allocation3], 64  }
  0x23   :  { %134 = vsyncadd [#allocation3], 4294967232 }
  0x24   :  { %135 = dma.done.wait [#allocation6], 64  }
  0x25   :  { %136 = vsyncadd [#allocation6], 4294967232  ;;  %v36_v0 = vld [vmem:[#allocation5] sm:$0x1]  ;;  %v37_v1 = vld [vmem:[#allocation2] sm:$0x1] }
  0x26   :  { %v39_v2 = vld [vmem:[#allocation5 + $0x1] sm:$0x1]  ;;  %v38_v3 = vmul.f32 %v37_v1, %v36_v0  ;;  %v40_v4 = vld [vmem:[#allocation2 + $0x1] sm:$0x1]  ;;  %v43_v5 = vld [vmem:[#allocation5 + $0x2] sm:$0x1] }
  0x27   :  { %v44_v6 = vld [vmem:[#allocation2 + $0x2] sm:$0x1]  ;;  %v41_v7 = vmul.f32 %v40_v4, %v39_v2  ;;  %s141_s4 = smov [#allocation7]  }
  0x28   :  { %v45_v8 = vmul.f32 %v44_v6, %v43_v5  ;;  %s54_s5 = sshll.u32 %s141_s4, 4  ;;  %s55_s5 = int_to_ptr.vmem [resolvable:$true] %s54_s5 }
  0x29   :  { %v42_v9 = vadd.f32 %v41_v7, %v38_v3  ;;  %s111_s1 = scalar_lea.vmem %s55_s5, 16  ;;  %s115_s6 = scalar_lea.vmem %s55_s5, 32 }
  0x2a   :  { %p112_p2 = scmp.ne.s32.totalorder %s55_s5, %s111_s1  ;;  %p116_p3 = scmp.lt.s32.totalorder %s55_s5, %s55_s5 }
  0x2b   :  { %v46_v10 = vadd.f32 %v45_v8, %v42_v9  ;;  %p117_p4 = scmp.lt.s32.totalorder %s115_s6, %s111_s1 }
  0x2d   :  { %47 = vst [vmem:[#allocation7] sm:$0x1] %v46_v10  ;;  %p118_p5 = por %p117_p4, %p116_p3 }
  0x2f   :  { %p119_p6 = pnand %p118_p5, %p112_p2 }
  0x31   :  { %122 = shalt.err (!%p119_p6)
}
  0x32   :  { %s123_s9 = scalar_lea.hbm %s195_s2, 16 }
  0x33   :  { %p124_p7 = scmp.ne.s32.totalorder %s195_s2, %s123_s9  ;;  %p127_p8 = scmp.lt.u32.totalorder %s123_s9, %s195_s2 }
  0x35   :  { %p129_p9 = pnand %p127_p8, %p124_p7 }
  0x37   :  { %132 = shalt.err (!%p129_p9)
}
  0x38   :  { %57 = dma.vmem_to_hbm [thread:$0]  %s55_s5, 16, %s195_s2, [#allocation4]  }
  0x39   :  { %137 = dma.done.wait [#allocation4], 16  }
  0x3a   :  { %138 = vsyncadd [#allocation4], 4294967280 }
  0x3b   :  { %61 = vsyncpa [#allocation3], 1 }
  0x3c   :  { %62 = vsyncpa [#allocation6], 1 }
  0x3d   :  { %63 = vsyncpa [#allocation4], 1 }

</bundles_post_ra>
